<compile_context>
chip_gen: v7x
topology: tpu7x:2x2x1
jax: 0.10.0
libtpu: 0.0.40
codegen_flags: <defaults>
</compile_context>

<pallas_src>
import functools

import jax
import jax.numpy as jnp
from jax.experimental import pallas as pl
from jax.experimental.pallas import tpu as pltpu

BN_EPS = 1e-5


def _cdiv(a, b):
    return -(-a // b)


def _round_up(x, m):
    return _cdiv(x, m) * m


def _tpu_vmem_capacity_bytes():
    try:
        return int(pltpu.get_tpu_info().vmem_capacity_bytes)
    except Exception:
        return 64 * 1024 * 1024   # conservative fallback: v7x per-TensorCore VMEM


def _pick_tile_rows(M, K, cout_mxu, cout_store, tile_budget):
    """VMEM-budget-aware, balanced M tiling (rows per grid step)."""
    def footprint(tm):
        return (2 * tm * K * 2             # patch tile, bf16, double-buffered
                + 2 * K * cout_mxu * 2     # weight tile (constant index), bf16, dbuf
                + 4 * tm * cout_store * 4  # y / output f32 tiles, dbuf
                + 8 * cout_mxu * 4)        # stats / scale / shift (tiny)
    tm = 2048                              # review: 1024-2048 sweet spot when it fits
    while tm > 256 and footprint(tm) > tile_budget:
        tm //= 2
    # TODO(synk): for very large K (>= ~1024) add a K grid axis with a VMEM
    # accumulator instead of letting TM shrink (keeps tiles small on v7x).
    n_tiles = max(1, _cdiv(M, tm))
    TM = _round_up(_cdiv(M, n_tiles), 16)  # balanced tiles; bf16 sublane packing
    return TM, n_tiles


# ---------------------------------------------------------------------------
# Pass-1 kernels: matmul tile + per-tile channel statistics (parallel grid).
# ---------------------------------------------------------------------------
def _matmul_stats_kernel(p_ref, w_ref, sum_ref, sq_ref):
    y = jnp.dot(p_ref[...], w_ref[...], preferred_element_type=jnp.float32)
    sum_ref[...] = jnp.sum(y, axis=0, keepdims=True).reshape(1, 1, -1)
    sq_ref[...] = jnp.sum(y * y, axis=0, keepdims=True).reshape(1, 1, -1)


def _matmul_stats_store_kernel(p_ref, w_ref, sum_ref, sq_ref, y_ref, *, cout_store):
    y = jnp.dot(p_ref[...], w_ref[...], preferred_element_type=jnp.float32)
    sum_ref[...] = jnp.sum(y, axis=0, keepdims=True).reshape(1, 1, -1)
    sq_ref[...] = jnp.sum(y * y, axis=0, keepdims=True).reshape(1, 1, -1)
    y_ref[...] = y[:, :cout_store]


# ---------------------------------------------------------------------------
# Pass-2 kernels: fused BN affine + activation.
# ---------------------------------------------------------------------------
def _apply_act(y, if_act, act):
    if not if_act:
        return y
    if act == "relu":
        return jnp.maximum(y, 0.0)
    if act == "hardswish":
        return y * jnp.clip(y + 3.0, 0.0, 6.0) * (1.0 / 6.0)
    # PyTorch module prints and exit()s; fail loudly at trace time instead.
    raise ValueError("The activation function({}) is selected incorrectly.".format(act))


def _matmul_bn_act_kernel(p_ref, w_ref, scale_ref, shift_ref, o_ref, *,
                          if_act, act, cout_store):
    y = jnp.dot(p_ref[...], w_ref[...], preferred_element_type=jnp.float32)
    if cout_store < y.shape[-1]:
        y = y[:, :cout_store]              # drop MXU lane padding before the store
    y = y * scale_ref[...] + shift_ref[...]
    o_ref[...] = _apply_act(y, if_act, act).astype(o_ref.dtype)


def _bn_act_kernel(y_ref, scale_ref, shift_ref, o_ref, *, if_act, act):
    y = y_ref[...] * scale_ref[...] + shift_ref[...]
    o_ref[...] = _apply_act(y, if_act, act).astype(o_ref.dtype)


@functools.partial(jax.jit,
                   static_argnames=("stride", "padding", "if_act", "act"))
def conv_bn_layer(x, weight, bias, gamma, beta, *, stride, padding,
                  if_act=True, act="relu"):
    """ConvBNLayer.forward (training-mode BN). x: (N,Cin,H,W) f32 -> (N,Cout,OH,OW) f32."""
    N, Cin, H, W = x.shape
    Cout, Cin_w, kh, kw = weight.shape
    assert Cin_w == Cin  # TODO(synk): groups != 1 (grouped conv) not supported
    # `bias` is unused: a per-channel constant cancels exactly under
    # training-mode (batch-stat) BatchNorm.
    # TODO(synk): eval-mode BN (running_mean/running_var) not implemented;
    # reinstate the conv bias if it is added.
    OH = (H + 2 * padding - kh) // stride + 1
    OW = (W + 2 * padding - kw) // stride + 1
    M = N * OH * OW
    K = Cin * kh * kw

    # --- im2col via one fused XLA op, NHWC end-to-end. Patch feature order is
    # c*(kh*kw) + i*kw + j, matching weight.reshape(Cout, Cin*kh*kw). bf16 cast
    # happens BEFORE the transpose so the relayout moves half the bytes.
    # TODO(synk): for stacked layers keep activations NHWC between layers to
    # drop this transpose and the final NCHW transpose entirely.
    # TODO(synk): longer term, read x directly via kh*kw shifted accumulated
    # matmuls instead of materializing the M*K im2col array in HBM.
    x_nhwc = jnp.transpose(x.astype(jnp.bfloat16), (0, 2, 3, 1))
    patches = jax.lax.conv_general_dilated_patches(
        x_nhwc, (kh, kw), (stride, stride),
        [(padding, padding), (padding, padding)],
        dimension_numbers=("NHWC", "HWIO", "NHWC"))     # (N, OH, OW, K) bf16
    patches = patches.reshape(M, K)

    # --- lane padding -------------------------------------------------------
    cout_mxu = _round_up(Cout, 128)        # weight lanes: lane-dense MXU result
    # Output store width: 128-lane padding only when Cout is already large;
    # small-Cout layers store round_up(Cout, 8) lanes (full-array-dim BlockSpec
    # exemption) so the HBM write is not inflated up to 16x.
    cout_store = cout_mxu if Cout >= 128 else _round_up(Cout, 8)

    # --- VMEM-budget-aware, balanced M tiling -------------------------------
    vmem_cap = _tpu_vmem_capacity_bytes()
    vmem_limit = int(min(vmem_cap * 3 // 4, 96 * 1024 * 1024))
    TM, n_tiles = _pick_tile_rows(M, K, cout_mxu, cout_store,
                                  tile_budget=(vmem_limit * 3) // 4)
    Mp = TM * n_tiles
    patches = jnp.pad(patches, ((0, Mp - M), (0, 0)))   # zero rows: stats-neutral

    wmat = weight.reshape(Cout, K).T.astype(jnp.float32)        # (K, Cout)
    wmat = jnp.pad(wmat, ((0, 0), (0, cout_mxu - Cout))).astype(jnp.bfloat16)

    p_spec = pl.BlockSpec((TM, K), lambda i: (i, 0))
    w_spec = pl.BlockSpec((K, cout_mxu), lambda i: (0, 0))
    # TODO(synk): pipeline_mode=pl.Buffered(1) on the constant-index operands
    # (w_spec / c_spec) would free their second VMEM buffer (matters for big K).
    s_spec = pl.BlockSpec((1, 1, cout_mxu), lambda i: (i, 0, 0))
    c_spec = pl.BlockSpec((1, cout_store), lambda i: (0, 0))
    o_spec = pl.BlockSpec((TM, cout_store), lambda i: (i, 0))
    cparams = pltpu.CompilerParams(dimension_semantics=("parallel",),
                                   vmem_limit_bytes=vmem_limit)
    stats_shape = jax.ShapeDtypeStruct((n_tiles, 1, cout_mxu), jnp.float32)

    # Strategy: recompute the matmul in pass 2 (patches read twice, extra
    # 2*M*K*2 bytes) vs. store y f32 once and make pass 2 elementwise
    # (extra 8*M*cout_store bytes of y traffic). Store y when K > 4*cout_store.
    store_y = K > 4 * cout_store

    # --- pass 1: per-tile partial sums / sums-of-squares (parallel) ---------
    if store_y:
        tile_sum, tile_sq, y = pl.pallas_call(
            functools.partial(_matmul_stats_store_kernel, cout_store=cout_store),
            out_shape=(stats_shape, stats_shape,
                       jax.ShapeDtypeStruct((Mp, cout_store), jnp.float32)),
            grid=(n_tiles,),
            in_specs=[p_spec, w_spec],
            out_specs=(s_spec, s_spec, o_spec),
            compiler_params=cparams,
        )(patches, wmat)
    else:
        tile_sum, tile_sq = pl.pallas_call(
            _matmul_stats_kernel,
            out_shape=(stats_shape, stats_shape),
            grid=(n_tiles,),
            in_specs=[p_spec, w_spec],
            out_specs=(s_spec, s_spec),
            compiler_params=cparams,
        )(patches, wmat)

    # --- fold batch stats + gamma/beta into one affine (tiny XLA math) ------
    inv_m = 1.0 / float(M)                 # true M; zero-padded rows add 0
    ch_sum = jnp.sum(tile_sum[:, 0, :Cout], axis=0)      # pairwise XLA reduce
    ch_sq = jnp.sum(tile_sq[:, 0, :Cout], axis=0)
    mean = ch_sum * inv_m
    var = jnp.maximum(ch_sq * inv_m - mean * mean, 0.0)  # biased variance (BN train)
    inv_std = jax.lax.rsqrt(var + BN_EPS)
    scale = gamma.astype(jnp.float32) * inv_std
    shift = beta.astype(jnp.float32) - mean * scale
    scale = jnp.pad(scale, (0, cout_store - Cout)).reshape(1, cout_store)
    shift = jnp.pad(shift, (0, cout_store - Cout)).reshape(1, cout_store)

    # --- pass 2: affine + activation (parallel) ------------------------------
    if store_y:
        out = pl.pallas_call(
            functools.partial(_bn_act_kernel, if_act=if_act, act=act),
            out_shape=jax.ShapeDtypeStruct((Mp, cout_store), jnp.float32),
            grid=(n_tiles,),
            in_specs=[o_spec, c_spec, c_spec],
            out_specs=o_spec,
            input_output_aliases={0: 0},   # write the affine result in place of y
            compiler_params=cparams,
        )(y, scale, shift)
    else:
        out = pl.pallas_call(
            functools.partial(_matmul_bn_act_kernel, if_act=if_act, act=act,
                              cout_store=cout_store),
            out_shape=jax.ShapeDtypeStruct((Mp, cout_store), jnp.float32),
            grid=(n_tiles,),
            in_specs=[p_spec, w_spec, c_spec, c_spec],
            out_specs=o_spec,
            compiler_params=cparams,
        )(patches, wmat, scale, shift)

    # (Mp, cout_store) -> strip padding -> (N, OH, OW, Cout) -> NCHW
    out = out[:M, :Cout].reshape(N, OH, OW, Cout)
    return jnp.transpose(out, (0, 3, 1, 2))


# ---------------------------------------------------------------------------
# Pure-JAX reference + self-test
# ---------------------------------------------------------------------------
def _reference(x, weight, bias, gamma, beta, *, stride, padding, if_act, act):
    y = jax.lax.conv_general_dilated(
        x, weight, (stride, stride),
        [(padding, padding), (padding, padding)],
        dimension_numbers=("NCHW", "OIHW", "NCHW"))
    y = y + bias[None, :, None, None]
    mean = jnp.mean(y, axis=(0, 2, 3), keepdims=True)
    var = jnp.mean((y - mean) ** 2, axis=(0, 2, 3), keepdims=True)
    y = (y - mean) * jax.lax.rsqrt(var + BN_EPS)
    y = y * gamma[None, :, None, None] + beta[None, :, None, None]
    if if_act:
        if act == "relu":
            y = jnp.maximum(y, 0.0)
        elif act == "hardswish":
            y = y * jnp.clip(y + 3.0, 0.0, 6.0) / 6.0
    return y


def _run_case(key, N, Cin, H, W, Cout, ksize, stride, padding, act):
    kx, kw_, kb, kg, kbe = jax.random.split(key, 5)
    x = jax.random.normal(kx, (N, Cin, H, W), dtype=jnp.float32)
    weight = 0.1 * jax.random.normal(kw_, (Cout, Cin, ksize, ksize), jnp.float32)
    bias = 0.05 * jax.random.normal(kb, (Cout,), jnp.float32)
    gamma = 1.0 + 0.1 * jax.random.normal(kg, (Cout,), jnp.float32)
    beta = 0.1 * jax.random.normal(kbe, (Cout,), jnp.float32)

    out = conv_bn_layer(x, weight, bias, gamma, beta, stride=stride,
                        padding=padding, if_act=True, act=act)
    out = jax.block_until_ready(out)
    OH = (H + 2 * padding - ksize) // stride + 1
    OW = (W + 2 * padding - ksize) // stride + 1
    assert out.shape == (N, Cout, OH, OW), out.shape

    # Reference uses conv operands rounded to bf16 (the kernel feeds the MXU
    # bf16 operands with f32 accumulation); BN / activation math is f32 on
    # both sides, so the comparison stays tight.
    xq = x.astype(jnp.bfloat16).astype(jnp.float32)
    wq = weight.astype(jnp.bfloat16).astype(jnp.float32)
    ref = _reference(xq, wq, bias, gamma, beta, stride=stride, padding=padding,
                     if_act=True, act=act)
    max_err = float(jnp.max(jnp.abs(out - ref)))
    assert jnp.allclose(out, ref, atol=2e-3, rtol=2e-3), max_err


if __name__ == "__main__":
    key = jax.random.PRNGKey(0)
    k1, k2 = jax.random.split(key)
    # Shapes consistent with ConvBNLayer(in=4, out=8, k=3, stride=1, pad=1);
    # K=36 > 4*cout_store=32 -> exercises the "store-y" strategy.
    _run_case(k1, N=2, Cin=4, H=16, W=16, Cout=8, ksize=3, stride=1, padding=1,
              act="relu")
    # Wider / strided layer (Cout=64, stride=2): exercises the "recompute"
    # strategy and the hardswish activation.
    _run_case(k2, N=2, Cin=4, H=16, W=16, Cout=64, ksize=3, stride=2, padding=1,
              act="hardswish")
    print("KERNEL_OK")
</pallas_src>

<mosaic_0001>
module attributes {stable_mosaic.version = 11 : i64} {
  func.func @_matmul_stats_store_kernel(%arg0: i32, %arg1: memref<512x36xbf16, #tpu.memory_space<vmem>>, %arg2: memref<36x128xbf16, #tpu.memory_space<vmem>>, %arg3: memref<1x1x128xf32, #tpu.memory_space<vmem>>, %arg4: memref<1x1x128xf32, #tpu.memory_space<vmem>>, %arg5: memref<512x8xf32, #tpu.memory_space<vmem>>) attributes {dimension_semantics = [#tpu.dimension_semantics<parallel>], iteration_bounds = array<i64: 1>, scalar_prefetch = 0 : i64, scratch_operands = 0 : i64, tpu.core_type = #tpu.core_type<tc>, window_params = [{transform_indices = @transform_0, window_bounds = array<i64: 512, 36>}, {pipeline_mode = #tpu.pipeline_mode<synchronous>, transform_indices = @transform_1, window_bounds = array<i64: 36, 128>}, {transform_indices = @transform_2, window_bounds = array<i64: 1, 1, 128>}, {transform_indices = @transform_3, window_bounds = array<i64: 1, 1, 128>}, {transform_indices = @transform_4, window_bounds = array<i64: 512, 8>}]} {
    %c0 = arith.constant 0 : index
    %c0_0 = arith.constant 0 : index
    %0 = vector.load %arg1[%c0, %c0_0] : memref<512x36xbf16, #tpu.memory_space<vmem>>, vector<512x36xbf16>
    %c0_1 = arith.constant 0 : index
    %c0_2 = arith.constant 0 : index
    %1 = vector.load %arg2[%c0_1, %c0_2] : memref<36x128xbf16, #tpu.memory_space<vmem>>, vector<36x128xbf16>
    %cst = arith.constant dense<0.000000e+00> : vector<512x128xf32>
    %2 = tpu.matmul %0, %1, %cst {dimension_numbers = #tpu.dot_dimension_numbers<[1], [0], [0], [1], [0, 0, 1, 1], [], []>} : vector<512x36xbf16>, vector<36x128xbf16>, vector<512x128xf32> -> vector<512x128xf32>
    %cst_3 = arith.constant dense<0.000000e+00> : vector<128xf32>
    %3 = vector.multi_reduction <add>, %2, %cst_3 [0] : vector<512x128xf32> to vector<128xf32>
    %4 = vector.shape_cast %3 : vector<128xf32> to vector<1x128xf32>
    %5 = vector.shape_cast %4 : vector<1x128xf32> to vector<1x1x128xf32>
    %c0_4 = arith.constant 0 : index
    %c0_5 = arith.constant 0 : index
    %c0_6 = arith.constant 0 : index
    %6 = vector.load %arg3[%c0_4, %c0_5, %c0_6] : memref<1x1x128xf32, #tpu.memory_space<vmem>>, vector<1x1x128xf32>
    tpu.vector_store %arg3[%c0_4, %c0_5, %c0_6], %5 {strides = array<i32>} : memref<1x1x128xf32, #tpu.memory_space<vmem>>, vector<1x1x128xf32>,
    %7 = arith.mulf %2, %2 : vector<512x128xf32>
    %cst_7 = arith.constant dense<0.000000e+00> : vector<128xf32>
    %8 = vector.multi_reduction <add>, %7, %cst_7 [0] : vector<512x128xf32> to vector<128xf32>
    %9 = vector.shape_cast %8 : vector<128xf32> to vector<1x128xf32>
    %10 = vector.shape_cast %9 : vector<1x128xf32> to vector<1x1x128xf32>
    %c0_8 = arith.constant 0 : index
    %c0_9 = arith.constant 0 : index
    %c0_10 = arith.constant 0 : index
    %11 = vector.load %arg4[%c0_8, %c0_9, %c0_10] : memref<1x1x128xf32, #tpu.memory_space<vmem>>, vector<1x1x128xf32>
    tpu.vector_store %arg4[%c0_8, %c0_9, %c0_10], %10 {strides = array<i32>} : memref<1x1x128xf32, #tpu.memory_space<vmem>>, vector<1x1x128xf32>,
    %12 = vector.extract_strided_slice %2 {offsets = [0, 0], sizes = [512, 8], strides = [1, 1]} : vector<512x128xf32> to vector<512x8xf32>
    %c0_11 = arith.constant 0 : index
    %c0_12 = arith.constant 0 : index
    %13 = vector.load %arg5[%c0_11, %c0_12] : memref<512x8xf32, #tpu.memory_space<vmem>>, vector<512x8xf32>
    tpu.vector_store %arg5[%c0_11, %c0_12], %12 {strides = array<i32>} : memref<512x8xf32, #tpu.memory_space<vmem>>, vector<512x8xf32>,
    return
  }
  func.func @transform_0(%arg0: i32) -> (i32, i32) {
    %c0_i32 = arith.constant 0 : i32
    %c0_i32_0 = arith.constant 0 : i32
    return %arg0, %c0_i32 : i32, i32
  }
  func.func @transform_1(%arg0: i32) -> (i32, i32) {
    %c0_i32 = arith.constant 0 : i32
    %c0_i32_0 = arith.constant 0 : i32
    %c0_i32_1 = arith.constant 0 : i32
    return %c0_i32, %c0_i32_0 : i32, i32
  }
  func.func @transform_2(%arg0: i32) -> (i32, i32, i32) {
    %c0_i32 = arith.constant 0 : i32
    %c0_i32_0 = arith.constant 0 : i32
    %c0_i32_1 = arith.constant 0 : i32
    return %arg0, %c0_i32, %c0_i32_0 : i32, i32, i32
  }
  func.func @transform_3(%arg0: i32) -> (i32, i32, i32) {
    %c0_i32 = arith.constant 0 : i32
    %c0_i32_0 = arith.constant 0 : i32
    %c0_i32_1 = arith.constant 0 : i32
    return %arg0, %c0_i32, %c0_i32_0 : i32, i32, i32
  }
  func.func @transform_4(%arg0: i32) -> (i32, i32) {
    %c0_i32 = arith.constant 0 : i32
    %c0_i32_0 = arith.constant 0 : i32
    return %arg0, %c0_i32 : i32, i32
  }
}

module attributes {stable_mosaic.version = 11 : i64} {
  func.func @_bn_act_kernel(%arg0: i32, %arg1: memref<512x8xf32, #tpu.memory_space<vmem>>, %arg2: memref<1x8xf32, #tpu.memory_space<vmem>>, %arg3: memref<1x8xf32, #tpu.memory_space<vmem>>, %arg4: memref<512x8xf32, #tpu.memory_space<vmem>>) attributes {dimension_semantics = [#tpu.dimension_semantics<parallel>], iteration_bounds = array<i64: 1>, scalar_prefetch = 0 : i64, scratch_operands = 0 : i64, tpu.core_type = #tpu.core_type<tc>, window_params = [{transform_indices = @transform_0, window_bounds = array<i64: 512, 8>}, {pipeline_mode = #tpu.pipeline_mode<synchronous>, transform_indices = @transform_1, window_bounds = array<i64: 1, 8>}, {pipeline_mode = #tpu.pipeline_mode<synchronous>, transform_indices = @transform_2, window_bounds = array<i64: 1, 8>}, {transform_indices = @transform_3, window_bounds = array<i64: 512, 8>}]} {
    %c0 = arith.constant 0 : index
    %c0_0 = arith.constant 0 : index
    %0 = vector.load %arg1[%c0, %c0_0] : memref<512x8xf32, #tpu.memory_space<vmem>>, vector<512x8xf32>
    %c0_1 = arith.constant 0 : index
    %c0_2 = arith.constant 0 : index
    %1 = vector.load %arg2[%c0_1, %c0_2] : memref<1x8xf32, #tpu.memory_space<vmem>>, vector<1x8xf32>
    %2 = vector.broadcast %1 : vector<1x8xf32> to vector<512x8xf32>
    %3 = arith.mulf %0, %2 : vector<512x8xf32>
    %c0_3 = arith.constant 0 : index
    %c0_4 = arith.constant 0 : index
    %4 = vector.load %arg3[%c0_3, %c0_4] : memref<1x8xf32, #tpu.memory_space<vmem>>, vector<1x8xf32>
    %5 = vector.broadcast %4 : vector<1x8xf32> to vector<512x8xf32>
    %6 = arith.addf %3, %5 : vector<512x8xf32>
    %cst = arith.constant 0.000000e+00 : f32
    %7 = vector.broadcast %cst : f32 to vector<512x8xf32>
    %8 = arith.maximumf %6, %7 : vector<512x8xf32>
    %c0_5 = arith.constant 0 : index
    %c0_6 = arith.constant 0 : index
    %9 = vector.load %arg4[%c0_5, %c0_6] : memref<512x8xf32, #tpu.memory_space<vmem>>, vector<512x8xf32>
    tpu.vector_store %arg4[%c0_5, %c0_6], %8 {strides = array<i32>} : memref<512x8xf32, #tpu.memory_space<vmem>>, vector<512x8xf32>,
    return
  }
  func.func @transform_0(%arg0: i32) -> (i32, i32) {
    %c0_i32 = arith.constant 0 : i32
    %c0_i32_0 = arith.constant 0 : i32
    return %arg0, %c0_i32 : i32, i32
  }
  func.func @transform_1(%arg0: i32) -> (i32, i32) {
    %c0_i32 = arith.constant 0 : i32
    %c0_i32_0 = arith.constant 0 : i32
    %c0_i32_1 = arith.constant 0 : i32
    return %c0_i32, %c0_i32_0 : i32, i32
  }
  func.func @transform_2(%arg0: i32) -> (i32, i32) {
    %c0_i32 = arith.constant 0 : i32
    %c0_i32_0 = arith.constant 0 : i32
    %c0_i32_1 = arith.constant 0 : i32
    return %c0_i32, %c0_i32_0 : i32, i32
  }
  func.func @transform_3(%arg0: i32) -> (i32, i32) {
    %c0_i32 = arith.constant 0 : i32
    %c0_i32_0 = arith.constant 0 : i32
    return %arg0, %c0_i32 : i32, i32
  }
}

</mosaic_0001>

<bundles_post_ra>
// kernel: conv_bn_layer.3
= control target key start
LH: loop header
LB: loop body
LE: loop exit
PB: predicated region body
PF: predicated region fallthrough
CT: control target
= control target key end

     0   :  { %vm284_vm0 = vcmask 64512   ;;  %s961_s0 = inlined_call_operand.vmem [shape: f32[512,8], index: 0, kind: input, shape index: {}, may-alias: {0,3}]   ;;  %s962_s1 = inlined_call_operand.vmem [shape: f32[1,8], index: 1, kind: input, shape index: {}]   ;;  %s963_s2 = inlined_call_operand.vmem [shape: f32[1,8], index: 2, kind: input, shape index: {}]   ;;  %s964_s3 = inlined_call_operand.vmem [shape: f32[512,8], index: 3, kind: output, shape index: {}, may-alias: {0,3}]  }
   0x1   :  { %v14_v0 = vld [vmem:[%s961_s0] sm:$0xff]  ;;  %v15_v4 = vld [vmem:[%s961_s0 + $0x8] sm:$0xff]  ;;  %v16_v5 = vld [vmem:[%s961_s0 + $0x10] sm:$0xff] }
   0x2   :  { %v381_v1 = vld [vmem:[%s962_s1] ss:$0 sm:$0xff]  ;;  %v17_v6 = vld [vmem:[%s961_s0 + $0x18] sm:$0xff]  ;;  %v19_v11 = vld [vmem:[%s961_s0 + $0x28] sm:$0xff] }
   0x3   :  { %v386_v2 = vld [vmem:[%s963_s2] ss:$0 sm:$0xff]  ;;  %v85_v3 = vmul.f32 %v381_v1, %v14_v0  ;;  %v86_v7 = vmul.f32 %v381_v1, %v15_v4  ;;  %v87_v8 = vmul.f32 %v381_v1, %v16_v5  ;;  %v88_v9 = vmul.f32 %v381_v1, %v17_v6  ;;  %v20_v12 = vld [vmem:[%s961_s0 + $0x30] sm:$0xff]  ;;  %v21_v17 = vld [vmem:[%s961_s0 + $0x38] sm:$0xff] }
   0x4   :  { %v18_v10 = vld [vmem:[%s961_s0 + $0x20] sm:$0xff]  ;;  %v90_v15 = vmul.f32 %v381_v1, %v19_v11  ;;  %v91_v16 = vmul.f32 %v381_v1, %v20_v12  ;;  %v92_v21 = vmul.f32 %v381_v1, %v21_v17  ;;  %v23_v27 = vld [vmem:[%s961_s0 + $0x48] sm:$0xff]  ;;  %v24_v28 = vld [vmem:[%s961_s0 + $0x50] sm:$0xff] }
   0x5   :  { %v156_v13 = vadd.f32 %v386_v2, %v85_v3  ;;  %v89_v14 = vmul.f32 %v381_v1, %v18_v10  ;;  %v157_v18 = vadd.f32 %v386_v2, %v86_v7  ;;  %v158_v19 = vadd.f32 %v386_v2, %v87_v8  ;;  %v22_v22 = vld [vmem:[%s961_s0 + $0x40] sm:$0xff]  ;;  %v25_v29 = vld [vmem:[%s961_s0 + $0x58] sm:$0xff]  ;;  %v27_v35 = vld [vmem:[%s961_s0 + $0x68] sm:$0xff] }
   0x6   :  { %v159_v20 = vadd.f32 %v386_v2, %v88_v9  ;;  %v161_v25 = vadd.f32 %v386_v2, %v90_v15  ;;  %v162_v26 = vadd.f32 %v386_v2, %v91_v16  ;;  %v163_v33 = vadd.f32 %v386_v2, %v92_v21  ;;  %v26_v34 = vld [vmem:[%s961_s0 + $0x60] sm:$0xff]  ;;  %v28_v36 = vld [vmem:[%s961_s0 + $0x70] sm:$0xff] }
   0x7   :  { %v220_v23 = vmax.f32 %v156_v13, 0.0  ;;  %v160_v24 = vadd.f32 %v386_v2, %v89_v14  ;;  %v221_v30 = vmax.f32 %v157_v18, 0.0  ;;  %v222_v31 = vmax.f32 %v158_v19, 0.0 }
   0x8   :  { %v223_v32 = vmax.f32 %v159_v20, 0.0  ;;  %v225_v38 = vmax.f32 %v161_v25, 0.0  ;;  %v226_v39 = vmax.f32 %v162_v26, 0.0  ;;  %v93_v40 = vmul.f32 %v381_v1, %v22_v22 }
   0x9   :  { %285 = vst.msk [vmem:[%s964_s3] sm:$0xff] %vm284_vm0, %v220_v23  ;;  %v224_v37 = vmax.f32 %v160_v24, 0.0  ;;  %v227_v42 = vmax.f32 %v163_v33, 0.0  ;;  %v94_v43 = vmul.f32 %v381_v1, %v23_v27  ;;  %v95_v44 = vmul.f32 %v381_v1, %v24_v28 }
   0xa   :  { %v96_v45 = vmul.f32 %v381_v1, %v25_v29  ;;  %v164_v46 = vadd.f32 %v386_v2, %v93_v40  ;;  %v97_v47 = vmul.f32 %v381_v1, %v26_v34  ;;  %v98_v48 = vmul.f32 %v381_v1, %v27_v35 }
   0xb   :  { %v99_v49 = vmul.f32 %v381_v1, %v28_v36  ;;  %v165_v50 = vadd.f32 %v386_v2, %v94_v43  ;;  %v166_v51 = vadd.f32 %v386_v2, %v95_v44 }
   0xc   :  { %v167_v52 = vadd.f32 %v386_v2, %v96_v45  ;;  %v228_v55 = vmax.f32 %v164_v46, 0.0  ;;  %v168_v56 = vadd.f32 %v386_v2, %v97_v47  ;;  %v169_v57 = vadd.f32 %v386_v2, %v98_v48 }
   0xd   :  { %v170_v58 = vadd.f32 %v386_v2, %v99_v49  ;;  %v229_v62 = vmax.f32 %v165_v50, 0.0  ;;  %v230_v63 = vmax.f32 %v166_v51, 0.0 }
   0xe   :  { %v231_v0 = vmax.f32 %v167_v52, 0.0  ;;  %v232_v7 = vmax.f32 %v168_v56, 0.0  ;;  %v233_v8 = vmax.f32 %v169_v57, 0.0 }
   0xf   :  { %v234_v9 = vmax.f32 %v170_v58, 0.0 }
  0x10   :  { %v29_v41 = vld [vmem:[%s961_s0 + $0x78] sm:$0xff] }
  0x11   :  { %286 = vst.msk [vmem:[%s964_s3 + $0x8] sm:$0xff] %vm284_vm0, %v221_v30  ;;  %287 = vst.msk [vmem:[%s964_s3 + $0x10] sm:$0xff] %vm284_vm0, %v222_v31  ;;  %v100_v53 = vmul.f32 %v381_v1, %v29_v41 }
  0x12   :  { %288 = vst.msk [vmem:[%s964_s3 + $0x18] sm:$0xff] %vm284_vm0, %v223_v32  ;;  %289 = vst.msk [vmem:[%s964_s3 + $0x20] sm:$0xff] %vm284_vm0, %v224_v37 }
  0x13   :  { %290 = vst.msk [vmem:[%s964_s3 + $0x28] sm:$0xff] %vm284_vm0, %v225_v38  ;;  %291 = vst.msk [vmem:[%s964_s3 + $0x30] sm:$0xff] %vm284_vm0, %v226_v39  ;;  %v171_v3 = vadd.f32 %v386_v2, %v100_v53 }
  0x14   :  { %292 = vst.msk [vmem:[%s964_s3 + $0x38] sm:$0xff] %vm284_vm0, %v227_v42 }
  0x15   :  { %v235_v12 = vmax.f32 %v171_v3, 0.0 }
  0x1b   :  { %v30_v54 = vld [vmem:[%s961_s0 + $0x80] sm:$0xff]  ;;  %v31_v59 = vld [vmem:[%s961_s0 + $0x88] sm:$0xff]  ;;  %v32_v60 = vld [vmem:[%s961_s0 + $0x90] sm:$0xff] }
  0x1c   :  { %v33_v61 = vld [vmem:[%s961_s0 + $0x98] sm:$0xff]  ;;  %v34_v4 = vld [vmem:[%s961_s0 + $0xa0] sm:$0xff]  ;;  %v35_v5 = vld [vmem:[%s961_s0 + $0xa8] sm:$0xff]  ;;  %v101_v10 = vmul.f32 %v381_v1, %v30_v54  ;;  %v102_v13 = vmul.f32 %v381_v1, %v31_v59  ;;  %v103_v14 = vmul.f32 %v381_v1, %v32_v60 }
  0x1d   :  { %v36_v6 = vld [vmem:[%s961_s0 + $0xb0] sm:$0xff]  ;;  %v104_v15 = vmul.f32 %v381_v1, %v33_v61  ;;  %v105_v17 = vmul.f32 %v381_v1, %v34_v4  ;;  %v106_v18 = vmul.f32 %v381_v1, %v35_v5 }
  0x1e   :  { %293 = vst.msk [vmem:[%s964_s3 + $0x40] sm:$0xff] %vm284_vm0, %v228_v55  ;;  %v172_v16 = vadd.f32 %v386_v2, %v101_v10  ;;  %v107_v19 = vmul.f32 %v381_v1, %v36_v6  ;;  %v173_v20 = vadd.f32 %v386_v2, %v102_v13  ;;  %v174_v21 = vadd.f32 %v386_v2, %v103_v14 }
  0x1f   :  { %v175_v22 = vadd.f32 %v386_v2, %v104_v15  ;;  %v176_v26 = vadd.f32 %v386_v2, %v105_v17  ;;  %v177_v27 = vadd.f32 %v386_v2, %v106_v18 }
  0x20   :  { %v236_v25 = vmax.f32 %v172_v16, 0.0  ;;  %v178_v28 = vadd.f32 %v386_v2, %v107_v19  ;;  %v237_v32 = vmax.f32 %v173_v20, 0.0  ;;  %v238_v33 = vmax.f32 %v174_v21, 0.0 }
  0x21   :  { %v239_v34 = vmax.f32 %v175_v22, 0.0  ;;  %v240_v39 = vmax.f32 %v176_v26, 0.0  ;;  %v241_v40 = vmax.f32 %v177_v27, 0.0 }
  0x22   :  { %v242_v41 = vmax.f32 %v178_v28, 0.0 }
  0x25   :  { %v37_v11 = vld [vmem:[%s961_s0 + $0xb8] sm:$0xff] }
  0x26   :  { %294 = vst.msk [vmem:[%s964_s3 + $0x48] sm:$0xff] %vm284_vm0, %v229_v62  ;;  %295 = vst.msk [vmem:[%s964_s3 + $0x50] sm:$0xff] %vm284_vm0, %v230_v63  ;;  %v108_v23 = vmul.f32 %v381_v1, %v37_v11 }
  0x27   :  { %296 = vst.msk [vmem:[%s964_s3 + $0x58] sm:$0xff] %vm284_vm0, %v231_v0  ;;  %297 = vst.msk [vmem:[%s964_s3 + $0x60] sm:$0xff] %vm284_vm0, %v232_v7 }
  0x28   :  { %298 = vst.msk [vmem:[%s964_s3 + $0x68] sm:$0xff] %vm284_vm0, %v233_v8  ;;  %299 = vst.msk [vmem:[%s964_s3 + $0x70] sm:$0xff] %vm284_vm0, %v234_v9  ;;  %v179_v35 = vadd.f32 %v386_v2, %v108_v23 }
  0x29   :  { %300 = vst.msk [vmem:[%s964_s3 + $0x78] sm:$0xff] %vm284_vm0, %v235_v12 }
  0x2a   :  { %v243_v44 = vmax.f32 %v179_v35, 0.0 }
  0x30   :  { %v38_v24 = vld [vmem:[%s961_s0 + $0xc0] sm:$0xff]  ;;  %v39_v29 = vld [vmem:[%s961_s0 + $0xc8] sm:$0xff]  ;;  %v40_v30 = vld [vmem:[%s961_s0 + $0xd0] sm:$0xff] }
  0x31   :  { %v41_v31 = vld [vmem:[%s961_s0 + $0xd8] sm:$0xff]  ;;  %v42_v36 = vld [vmem:[%s961_s0 + $0xe0] sm:$0xff]  ;;  %v43_v37 = vld [vmem:[%s961_s0 + $0xe8] sm:$0xff]  ;;  %v109_v42 = vmul.f32 %v381_v1, %v38_v24  ;;  %v110_v45 = vmul.f32 %v381_v1, %v39_v29  ;;  %v111_v46 = vmul.f32 %v381_v1, %v40_v30 }
  0x32   :  { %v44_v38 = vld [vmem:[%s961_s0 + $0xf0] sm:$0xff]  ;;  %v112_v47 = vmul.f32 %v381_v1, %v41_v31  ;;  %v113_v49 = vmul.f32 %v381_v1, %v42_v36  ;;  %v114_v50 = vmul.f32 %v381_v1, %v43_v37 }
  0x33   :  { %301 = vst.msk [vmem:[%s964_s3 + $0x80] sm:$0xff] %vm284_vm0, %v236_v25  ;;  %v180_v48 = vadd.f32 %v386_v2, %v109_v42  ;;  %v115_v51 = vmul.f32 %v381_v1, %v44_v38  ;;  %v181_v52 = vadd.f32 %v386_v2, %v110_v45  ;;  %v182_v53 = vadd.f32 %v386_v2, %v111_v46 }
  0x34   :  { %v183_v54 = vadd.f32 %v386_v2, %v112_v47  ;;  %v184_v58 = vadd.f32 %v386_v2, %v113_v49  ;;  %v185_v59 = vadd.f32 %v386_v2, %v114_v50 }
  0x35   :  { %v244_v57 = vmax.f32 %v180_v48, 0.0  ;;  %v186_v60 = vadd.f32 %v386_v2, %v115_v51  ;;  %v245_v0 = vmax.f32 %v181_v52, 0.0  ;;  %v246_v3 = vmax.f32 %v182_v53, 0.0 }
  0x36   :  { %v247_v4 = vmax.f32 %v183_v54, 0.0  ;;  %v248_v9 = vmax.f32 %v184_v58, 0.0  ;;  %v249_v10 = vmax.f32 %v185_v59, 0.0 }
  0x37   :  { %v250_v11 = vmax.f32 %v186_v60, 0.0 }
  0x3a   :  { %v45_v43 = vld [vmem:[%s961_s0 + $0xf8] sm:$0xff] }
  0x3b   :  { %302 = vst.msk [vmem:[%s964_s3 + $0x88] sm:$0xff] %vm284_vm0, %v237_v32  ;;  %303 = vst.msk [vmem:[%s964_s3 + $0x90] sm:$0xff] %vm284_vm0, %v238_v33  ;;  %v116_v55 = vmul.f32 %v381_v1, %v45_v43 }
  0x3c   :  { %304 = vst.msk [vmem:[%s964_s3 + $0x98] sm:$0xff] %vm284_vm0, %v239_v34  ;;  %305 = vst.msk [vmem:[%s964_s3 + $0xa0] sm:$0xff] %vm284_vm0, %v240_v39 }
  0x3d   :  { %306 = vst.msk [vmem:[%s964_s3 + $0xa8] sm:$0xff] %vm284_vm0, %v241_v40  ;;  %307 = vst.msk [vmem:[%s964_s3 + $0xb0] sm:$0xff] %vm284_vm0, %v242_v41  ;;  %v187_v5 = vadd.f32 %v386_v2, %v116_v55 }
  0x3e   :  { %308 = vst.msk [vmem:[%s964_s3 + $0xb8] sm:$0xff] %vm284_vm0, %v243_v44 }
  0x3f   :  { %v251_v14 = vmax.f32 %v187_v5, 0.0 }
  0x45   :  { %v46_v56 = vld [vmem:[%s961_s0 + $0x100] sm:$0xff]  ;;  %v47_v61 = vld [vmem:[%s961_s0 + $0x108] sm:$0xff]  ;;  %v48_v62 = vld [vmem:[%s961_s0 + $0x110] sm:$0xff] }
  0x46   :  { %v49_v63 = vld [vmem:[%s961_s0 + $0x118] sm:$0xff]  ;;  %v50_v6 = vld [vmem:[%s961_s0 + $0x120] sm:$0xff]  ;;  %v51_v7 = vld [vmem:[%s961_s0 + $0x128] sm:$0xff]  ;;  %v117_v12 = vmul.f32 %v381_v1, %v46_v56  ;;  %v118_v15 = vmul.f32 %v381_v1, %v47_v61  ;;  %v119_v16 = vmul.f32 %v381_v1, %v48_v62 }
  0x47   :  { %v52_v8 = vld [vmem:[%s961_s0 + $0x130] sm:$0xff]  ;;  %v120_v17 = vmul.f32 %v381_v1, %v49_v63  ;;  %v121_v19 = vmul.f32 %v381_v1, %v50_v6  ;;  %v122_v20 = vmul.f32 %v381_v1, %v51_v7 }
  0x48   :  { %309 = vst.msk [vmem:[%s964_s3 + $0xc0] sm:$0xff] %vm284_vm0, %v244_v57  ;;  %v188_v18 = vadd.f32 %v386_v2, %v117_v12  ;;  %v123_v21 = vmul.f32 %v381_v1, %v52_v8  ;;  %v189_v22 = vadd.f32 %v386_v2, %v118_v15  ;;  %v190_v23 = vadd.f32 %v386_v2, %v119_v16 }
  0x49   :  { %v191_v24 = vadd.f32 %v386_v2, %v120_v17  ;;  %v192_v28 = vadd.f32 %v386_v2, %v121_v19  ;;  %v193_v29 = vadd.f32 %v386_v2, %v122_v20 }
  0x4a   :  { %v252_v27 = vmax.f32 %v188_v18, 0.0  ;;  %v194_v30 = vadd.f32 %v386_v2, %v123_v21  ;;  %v253_v34 = vmax.f32 %v189_v22, 0.0  ;;  %v254_v35 = vmax.f32 %v190_v23, 0.0 }
  0x4b   :  { %v255_v36 = vmax.f32 %v191_v24, 0.0  ;;  %v256_v41 = vmax.f32 %v192_v28, 0.0  ;;  %v257_v42 = vmax.f32 %v193_v29, 0.0 }
  0x4c   :  { %v258_v43 = vmax.f32 %v194_v30, 0.0 }
  0x4f   :  { %v53_v13 = vld [vmem:[%s961_s0 + $0x138] sm:$0xff] }
  0x50   :  { %310 = vst.msk [vmem:[%s964_s3 + $0xc8] sm:$0xff] %vm284_vm0, %v245_v0  ;;  %311 = vst.msk [vmem:[%s964_s3 + $0xd0] sm:$0xff] %vm284_vm0, %v246_v3  ;;  %v124_v25 = vmul.f32 %v381_v1, %v53_v13 }
  0x51   :  { %312 = vst.msk [vmem:[%s964_s3 + $0xd8] sm:$0xff] %vm284_vm0, %v247_v4  ;;  %313 = vst.msk [vmem:[%s964_s3 + $0xe0] sm:$0xff] %vm284_vm0, %v248_v9 }
  0x52   :  { %314 = vst.msk [vmem:[%s964_s3 + $0xe8] sm:$0xff] %vm284_vm0, %v249_v10  ;;  %315 = vst.msk [vmem:[%s964_s3 + $0xf0] sm:$0xff] %vm284_vm0, %v250_v11  ;;  %v195_v37 = vadd.f32 %v386_v2, %v124_v25 }
  0x53   :  { %316 = vst.msk [vmem:[%s964_s3 + $0xf8] sm:$0xff] %vm284_vm0, %v251_v14 }
  0x54   :  { %v259_v46 = vmax.f32 %v195_v37, 0.0 }
  0x5a   :  { %v54_v26 = vld [vmem:[%s961_s0 + $0x140] sm:$0xff]  ;;  %v55_v31 = vld [vmem:[%s961_s0 + $0x148] sm:$0xff]  ;;  %v56_v32 = vld [vmem:[%s961_s0 + $0x150] sm:$0xff] }
  0x5b   :  { %v57_v33 = vld [vmem:[%s961_s0 + $0x158] sm:$0xff]  ;;  %v58_v38 = vld [vmem:[%s961_s0 + $0x160] sm:$0xff]  ;;  %v59_v39 = vld [vmem:[%s961_s0 + $0x168] sm:$0xff]  ;;  %v125_v44 = vmul.f32 %v381_v1, %v54_v26  ;;  %v126_v47 = vmul.f32 %v381_v1, %v55_v31  ;;  %v127_v48 = vmul.f32 %v381_v1, %v56_v32 }
  0x5c   :  { %v60_v40 = vld [vmem:[%s961_s0 + $0x170] sm:$0xff]  ;;  %v128_v49 = vmul.f32 %v381_v1, %v57_v33  ;;  %v129_v51 = vmul.f32 %v381_v1, %v58_v38  ;;  %v130_v52 = vmul.f32 %v381_v1, %v59_v39 }
  0x5d   :  { %317 = vst.msk [vmem:[%s964_s3 + $0x100] sm:$0xff] %vm284_vm0, %v252_v27  ;;  %v196_v50 = vadd.f32 %v386_v2, %v125_v44  ;;  %v131_v53 = vmul.f32 %v381_v1, %v60_v40  ;;  %v197_v54 = vadd.f32 %v386_v2, %v126_v47  ;;  %v198_v55 = vadd.f32 %v386_v2, %v127_v48 }
  0x5e   :  { %v199_v56 = vadd.f32 %v386_v2, %v128_v49  ;;  %v200_v60 = vadd.f32 %v386_v2, %v129_v51  ;;  %v201_v61 = vadd.f32 %v386_v2, %v130_v52 }
  0x5f   :  { %v260_v59 = vmax.f32 %v196_v50, 0.0  ;;  %v202_v62 = vadd.f32 %v386_v2, %v131_v53  ;;  %v261_v4 = vmax.f32 %v197_v54, 0.0  ;;  %v262_v5 = vmax.f32 %v198_v55, 0.0 }
  0x60   :  { %v263_v6 = vmax.f32 %v199_v56, 0.0  ;;  %v264_v11 = vmax.f32 %v200_v60, 0.0  ;;  %v265_v12 = vmax.f32 %v201_v61, 0.0 }
  0x61   :  { %v266_v13 = vmax.f32 %v202_v62, 0.0 }
  0x64   :  { %v61_v45 = vld [vmem:[%s961_s0 + $0x178] sm:$0xff] }
  0x65   :  { %318 = vst.msk [vmem:[%s964_s3 + $0x108] sm:$0xff] %vm284_vm0, %v253_v34  ;;  %319 = vst.msk [vmem:[%s964_s3 + $0x110] sm:$0xff] %vm284_vm0, %v254_v35  ;;  %v132_v57 = vmul.f32 %v381_v1, %v61_v45 }
  0x66   :  { %320 = vst.msk [vmem:[%s964_s3 + $0x118] sm:$0xff] %vm284_vm0, %v255_v36  ;;  %321 = vst.msk [vmem:[%s964_s3 + $0x120] sm:$0xff] %vm284_vm0, %v256_v41 }
  0x67   :  { %322 = vst.msk [vmem:[%s964_s3 + $0x128] sm:$0xff] %vm284_vm0, %v257_v42  ;;  %323 = vst.msk [vmem:[%s964_s3 + $0x130] sm:$0xff] %vm284_vm0, %v258_v43  ;;  %v203_v7 = vadd.f32 %v386_v2, %v132_v57 }
  0x68   :  { %324 = vst.msk [vmem:[%s964_s3 + $0x138] sm:$0xff] %vm284_vm0, %v259_v46 }
  0x69   :  { %v267_v16 = vmax.f32 %v203_v7, 0.0 }
  0x6f   :  { %v62_v58 = vld [vmem:[%s961_s0 + $0x180] sm:$0xff]  ;;  %v63_v63 = vld [vmem:[%s961_s0 + $0x188] sm:$0xff]  ;;  %v64_v0 = vld [vmem:[%s961_s0 + $0x190] sm:$0xff] }
  0x70   :  { %v65_v3 = vld [vmem:[%s961_s0 + $0x198] sm:$0xff]  ;;  %v66_v8 = vld [vmem:[%s961_s0 + $0x1a0] sm:$0xff]  ;;  %v67_v9 = vld [vmem:[%s961_s0 + $0x1a8] sm:$0xff]  ;;  %v133_v14 = vmul.f32 %v381_v1, %v62_v58  ;;  %v134_v17 = vmul.f32 %v381_v1, %v63_v63  ;;  %v135_v18 = vmul.f32 %v381_v1, %v64_v0 }
  0x71   :  { %v68_v10 = vld [vmem:[%s961_s0 + $0x1b0] sm:$0xff]  ;;  %v136_v19 = vmul.f32 %v381_v1, %v65_v3  ;;  %v137_v21 = vmul.f32 %v381_v1, %v66_v8  ;;  %v138_v22 = vmul.f32 %v381_v1, %v67_v9 }
  0x72   :  { %325 = vst.msk [vmem:[%s964_s3 + $0x140] sm:$0xff] %vm284_vm0, %v260_v59  ;;  %v204_v20 = vadd.f32 %v386_v2, %v133_v14  ;;  %v139_v23 = vmul.f32 %v381_v1, %v68_v10  ;;  %v205_v24 = vadd.f32 %v386_v2, %v134_v17  ;;  %v206_v25 = vadd.f32 %v386_v2, %v135_v18 }
  0x73   :  { %v207_v26 = vadd.f32 %v386_v2, %v136_v19  ;;  %v208_v30 = vadd.f32 %v386_v2, %v137_v21  ;;  %v209_v31 = vadd.f32 %v386_v2, %v138_v22 }
  0x74   :  { %v268_v29 = vmax.f32 %v204_v20, 0.0  ;;  %v210_v32 = vadd.f32 %v386_v2, %v139_v23  ;;  %v269_v36 = vmax.f32 %v205_v24, 0.0  ;;  %v270_v37 = vmax.f32 %v206_v25, 0.0 }
  0x75   :  { %v271_v38 = vmax.f32 %v207_v26, 0.0  ;;  %v272_v43 = vmax.f32 %v208_v30, 0.0  ;;  %v273_v44 = vmax.f32 %v209_v31, 0.0 }
  0x76   :  { %v274_v45 = vmax.f32 %v210_v32, 0.0 }
  0x79   :  { %v69_v15 = vld [vmem:[%s961_s0 + $0x1b8] sm:$0xff] }
  0x7a   :  { %326 = vst.msk [vmem:[%s964_s3 + $0x148] sm:$0xff] %vm284_vm0, %v261_v4  ;;  %327 = vst.msk [vmem:[%s964_s3 + $0x150] sm:$0xff] %vm284_vm0, %v262_v5  ;;  %v140_v27 = vmul.f32 %v381_v1, %v69_v15 }
  0x7b   :  { %328 = vst.msk [vmem:[%s964_s3 + $0x158] sm:$0xff] %vm284_vm0, %v263_v6  ;;  %329 = vst.msk [vmem:[%s964_s3 + $0x160] sm:$0xff] %vm284_vm0, %v264_v11 }
  0x7c   :  { %330 = vst.msk [vmem:[%s964_s3 + $0x168] sm:$0xff] %vm284_vm0, %v265_v12  ;;  %331 = vst.msk [vmem:[%s964_s3 + $0x170] sm:$0xff] %vm284_vm0, %v266_v13  ;;  %v211_v39 = vadd.f32 %v386_v2, %v140_v27 }
  0x7d   :  { %332 = vst.msk [vmem:[%s964_s3 + $0x178] sm:$0xff] %vm284_vm0, %v267_v16 }
  0x7e   :  { %v275_v48 = vmax.f32 %v211_v39, 0.0 }
  0x84   :  { %v70_v28 = vld [vmem:[%s961_s0 + $0x1c0] sm:$0xff]  ;;  %v71_v33 = vld [vmem:[%s961_s0 + $0x1c8] sm:$0xff]  ;;  %v72_v34 = vld [vmem:[%s961_s0 + $0x1d0] sm:$0xff] }
  0x85   :  { %v73_v35 = vld [vmem:[%s961_s0 + $0x1d8] sm:$0xff]  ;;  %v74_v40 = vld [vmem:[%s961_s0 + $0x1e0] sm:$0xff]  ;;  %v75_v41 = vld [vmem:[%s961_s0 + $0x1e8] sm:$0xff]  ;;  %v141_v46 = vmul.f32 %v381_v1, %v70_v28  ;;  %v142_v49 = vmul.f32 %v381_v1, %v71_v33  ;;  %v143_v50 = vmul.f32 %v381_v1, %v72_v34 }
  0x86   :  { %v76_v42 = vld [vmem:[%s961_s0 + $0x1f0] sm:$0xff]  ;;  %v144_v51 = vmul.f32 %v381_v1, %v73_v35  ;;  %v145_v53 = vmul.f32 %v381_v1, %v74_v40  ;;  %v146_v54 = vmul.f32 %v381_v1, %v75_v41 }
  0x87   :  { %333 = vst.msk [vmem:[%s964_s3 + $0x180] sm:$0xff] %vm284_vm0, %v268_v29  ;;  %v212_v52 = vadd.f32 %v386_v2, %v141_v46  ;;  %v147_v55 = vmul.f32 %v381_v1, %v76_v42  ;;  %v213_v56 = vadd.f32 %v386_v2, %v142_v49  ;;  %v214_v57 = vadd.f32 %v386_v2, %v143_v50 }
  0x88   :  { %v215_v58 = vadd.f32 %v386_v2, %v144_v51  ;;  %v216_v61 = vadd.f32 %v386_v2, %v145_v53  ;;  %v217_v62 = vadd.f32 %v386_v2, %v146_v54 }
  0x89   :  { %v276_v60 = vmax.f32 %v212_v52, 0.0  ;;  %v218_v63 = vadd.f32 %v386_v2, %v147_v55  ;;  %v277_v0 = vmax.f32 %v213_v56, 0.0  ;;  %v278_v3 = vmax.f32 %v214_v57, 0.0 }
  0x8a   :  { %v279_v4 = vmax.f32 %v215_v58, 0.0  ;;  %v280_v6 = vmax.f32 %v216_v61, 0.0  ;;  %v281_v7 = vmax.f32 %v217_v62, 0.0 }
  0x8e   :  { %v77_v47 = vld [vmem:[%s961_s0 + $0x1f8] sm:$0xff] }
  0x8f   :  { %334 = vst.msk [vmem:[%s964_s3 + $0x188] sm:$0xff] %vm284_vm0, %v269_v36  ;;  %335 = vst.msk [vmem:[%s964_s3 + $0x190] sm:$0xff] %vm284_vm0, %v270_v37  ;;  %v148_v59 = vmul.f32 %v381_v1, %v77_v47  ;;  %v282_v1 = vmax.f32 %v218_v63, 0.0 }
  0x90   :  { %336 = vst.msk [vmem:[%s964_s3 + $0x198] sm:$0xff] %vm284_vm0, %v271_v38  ;;  %337 = vst.msk [vmem:[%s964_s3 + $0x1a0] sm:$0xff] %vm284_vm0, %v272_v43 }
  0x91   :  { %338 = vst.msk [vmem:[%s964_s3 + $0x1a8] sm:$0xff] %vm284_vm0, %v273_v44  ;;  %339 = vst.msk [vmem:[%s964_s3 + $0x1b0] sm:$0xff] %vm284_vm0, %v274_v45  ;;  %v219_v5 = vadd.f32 %v386_v2, %v148_v59 }
  0x92   :  { %340 = vst.msk [vmem:[%s964_s3 + $0x1b8] sm:$0xff] %vm284_vm0, %v275_v48  ;;  %341 = vst.msk [vmem:[%s964_s3 + $0x1c0] sm:$0xff] %vm284_vm0, %v276_v60 }
  0x93   :  { %342 = vst.msk [vmem:[%s964_s3 + $0x1c8] sm:$0xff] %vm284_vm0, %v277_v0  ;;  %343 = vst.msk [vmem:[%s964_s3 + $0x1d0] sm:$0xff] %vm284_vm0, %v278_v3  ;;  %v283_v2 = vmax.f32 %v219_v5, 0.0 }
  0x94   :  { %344 = vst.msk [vmem:[%s964_s3 + $0x1d8] sm:$0xff] %vm284_vm0, %v279_v4  ;;  %345 = vst.msk [vmem:[%s964_s3 + $0x1e0] sm:$0xff] %vm284_vm0, %v280_v6 }
  0x95   :  { %346 = vst.msk [vmem:[%s964_s3 + $0x1e8] sm:$0xff] %vm284_vm0, %v281_v7  ;;  %347 = vst.msk [vmem:[%s964_s3 + $0x1f0] sm:$0xff] %vm284_vm0, %v282_v1 }
  0x96   :  { %348 = vst.msk [vmem:[%s964_s3 + $0x1f8] sm:$0xff] %vm284_vm0, %v283_v2 }

// kernel: conv_bn_layer.2
= control target key start
LH: loop header
LB: loop body
LE: loop exit
PB: predicated region body
PF: predicated region fallthrough
CT: control target
= control target key end

     0   :  { %vm259_vm0 = vcmask 293888   ;;  %vm356_vm1 = vcmask 1041408   ;;  %vm853_vm2 = vcmask 64512   ;;  %s1761_s1 = inlined_call_operand.vmem [shape: bf16[36,128], index: 1, kind: input, shape index: {}]   ;;  %s1762_s0 = inlined_call_operand.vmem [shape: bf16[512,36], index: 0, kind: input, shape index: {}]   ;;  %s1763_s4 = inlined_call_operand.vmem [shape: f32[512,8], index: 4, kind: output, shape index: {2}]   ;;  %s1764_s2 = inlined_call_operand.vmem [shape: f32[1,1,128], index: 2, kind: output, shape index: {0}]   ;;  %s1765_s3 = inlined_call_operand.vmem [shape: f32[1,1,128], index: 3, kind: output, shape index: {1}]  }
   0x1   :  { %v1110_v0 = vld [vmem:[%s1761_s1] sm:$0xff]   ;;  %v1111_v1 = vld [vmem:[%s1761_s1 + $0x8] sm:$0xff]   ;;  %v1112_v2 = vld [vmem:[%s1761_s1 + $0x10] ss:$0 sps:$4 sm:$0x33]  }
   0x2   :  { %1032 = vmatprep.subr.bf16.mxu0 %v1110_v0  ;;  %v1113_v3 = vld [vmem:[%s1762_s0] sm:$0xff]   ;;  %1102 = vmatprep.subr.bf16.mxu1 %v1110_v0  ;;  %v358_v4 = vsel %vm356_vm1, %v1112_v2, 0  ;;  %v1114_v5 = vld [vmem:[%s1762_s0 + $0x8] sm:$0xff]   ;;  %v1115_v6 = vld [vmem:[%s1762_s0 + $0x10] sm:$0xff]  }
   0x3   :  { %1033 = vmatpush3.bf16.msra.mxu0 %v1110_v0  ;;  %1105 = vmatpush3.bf16.msra.mxu1 %v1110_v0  ;;  %v1116_v7 = vld [vmem:[%s1762_s0 + $0x18] sm:$0xff]   ;;  %v1117_v8 = vld [vmem:[%s1762_s0 + $0x20] sm:$0xff]   ;;  %v1130_v10 = vld [vmem:[%s1762_s0 + $0x88] sm:$0xff]  }
   0x4   :  { %1034 = vmatprep.subr.bf16.mxu0 %v1111_v1  ;;  %1038 = vmatprep.mubr.msk.bf16.mxu0 %vm259_vm0, %v1113_v3  ;;  %v1129_v9 = vld [vmem:[%s1762_s0 + $0x80] sm:$0xff]   ;;  %v1131_v11 = vld [vmem:[%s1762_s0 + $0x90] sm:$0xff]   ;;  %v1118_v12 = vld [vmem:[%s1762_s0 + $0x28] sm:$0xff]  }
   0x5   :  { %1103 = vmatprep.subr.bf16.mxu1 %v1111_v1  ;;  %1070 = vmatprep.mubr.msk.bf16.mxu1 %vm259_vm0, %v1129_v9  ;;  %v1119_v13 = vld [vmem:[%s1762_s0 + $0x30] sm:$0xff]   ;;  %v1132_v14 = vld [vmem:[%s1762_s0 + $0x98] sm:$0xff]   ;;  %v1133_v15 = vld [vmem:[%s1762_s0 + $0xa0] sm:$0xff]  }
   0x6   :  { %v1120_v16 = vld [vmem:[%s1762_s0 + $0x38] sm:$0xff]   ;;  %v1134_v17 = vld [vmem:[%s1762_s0 + $0xa8] sm:$0xff]   ;;  %v1121_v18 = vld [vmem:[%s1762_s0 + $0x40] sm:$0xff]  }
   0x7   :  { %1035 = vmatpush3.bf16.msra.mxu0 %v1111_v1  ;;  %1106 = vmatpush3.bf16.msra.mxu1 %v1111_v1  ;;  %v1135_v19 = vld [vmem:[%s1762_s0 + $0xb0] sm:$0xff]   ;;  %v1122_v20 = vld [vmem:[%s1762_s0 + $0x48] sm:$0xff]   ;;  %v1136_v21 = vld [vmem:[%s1762_s0 + $0xb8] sm:$0xff]  }
   0x8   :  { %1108 = vmatprep.subr.msk.bf16.mxu0 %vm356_vm1, %v1112_v2  ;;  %1109 = vmatprep.subr.msk.bf16.mxu1 %vm356_vm1, %v1112_v2  ;;  %v1123_v22 = vld [vmem:[%s1762_s0 + $0x50] sm:$0xff]   ;;  %v1137_v23 = vld [vmem:[%s1762_s0 + $0xc0] sm:$0xff]   ;;  %v1124_v24 = vld [vmem:[%s1762_s0 + $0x58] sm:$0xff]  }
   0x9   :  { %v1138_v25 = vld [vmem:[%s1762_s0 + $0xc8] sm:$0xff]   ;;  %v1125_v26 = vld [vmem:[%s1762_s0 + $0x60] sm:$0xff]   ;;  %v1139_v27 = vld [vmem:[%s1762_s0 + $0xd0] sm:$0xff]  }
   0xa   :  { %v1126_v28 = vld [vmem:[%s1762_s0 + $0x68] sm:$0xff]   ;;  %v1140_v29 = vld [vmem:[%s1762_s0 + $0xd8] sm:$0xff]   ;;  %v1127_v30 = vld [vmem:[%s1762_s0 + $0x70] sm:$0xff]  }
   0xb   :  { %1037 = vmatpush3.bf16.msra.mxu0 %v358_v4  ;;  %1107 = vmatpush3.bf16.msra.mxu1 %v358_v4  ;;  %v1141_v31 = vld [vmem:[%s1762_s0 + $0xe0] sm:$0xff]   ;;  %v1128_v32 = vld [vmem:[%s1762_s0 + $0x78] sm:$0xff]   ;;  %v1142_v33 = vld [vmem:[%s1762_s0 + $0xe8] sm:$0xff]  }
   0xc   :  { %v1143_v34 = vld [vmem:[%s1762_s0 + $0xf0] sm:$0xff]   ;;  %v1144_v35 = vld [vmem:[%s1762_s0 + $0xf8] sm:$0xff]  }
   0xe   :  { %1039 = vmatmul.mubr.msk.bf16.vlgmr.msra.gmra.mrb[0].mxu0 %vm259_vm0, %v1114_v5  ;;  %1071 = vmatmul.mubr.msk.bf16.vlgmr.msra.gmra.mrb[0].mxu1 %vm259_vm0, %v1130_v10 }
   0xf   :  { %1042 = vmatprep.mubr.msk.bf16.mxu0 %vm259_vm0, %v1115_v6  ;;  %1074 = vmatprep.mubr.msk.bf16.mxu1 %vm259_vm0, %v1131_v11 }
  0x16   :  { %1043 = vmatmul.mubr.msk.bf16.gmra.mrb[4].mxu0 %vm259_vm0, %v1116_v7  ;;  %1075 = vmatmul.mubr.msk.bf16.gmra.mrb[4].mxu1 %vm259_vm0, %v1132_v14 }
  0x17   :  { %1046 = vmatprep.mubr.msk.bf16.mxu0 %vm259_vm0, %v1117_v8  ;;  %1078 = vmatprep.mubr.msk.bf16.mxu1 %vm259_vm0, %v1133_v15 }
  0x1e   :  { %1047 = vmatmul.mubr.msk.bf16.gmra.mrb[8].mxu0 %vm259_vm0, %v1118_v12  ;;  %1079 = vmatmul.mubr.msk.bf16.gmra.mrb[8].mxu1 %vm259_vm0, %v1134_v17 }
  0x1f   :  { %1050 = vmatprep.mubr.msk.bf16.mxu0 %vm259_vm0, %v1119_v13  ;;  %1082 = vmatprep.mubr.msk.bf16.mxu1 %vm259_vm0, %v1135_v19 }
  0x26   :  { %1051 = vmatmul.mubr.msk.bf16.gmra.mrb[12].mxu0 %vm259_vm0, %v1120_v16  ;;  %1083 = vmatmul.mubr.msk.bf16.gmra.mrb[12].mxu1 %vm259_vm0, %v1136_v21 }
  0x27   :  { %1054 = vmatprep.mubr.msk.bf16.mxu0 %vm259_vm0, %v1121_v18  ;;  %1086 = vmatprep.mubr.msk.bf16.mxu1 %vm259_vm0, %v1137_v23 }
  0x2e   :  { %1055 = vmatmul.mubr.msk.bf16.gmra.mrb[16].mxu0 %vm259_vm0, %v1122_v20  ;;  %1087 = vmatmul.mubr.msk.bf16.gmra.mrb[16].mxu1 %vm259_vm0, %v1138_v25 }
  0x2f   :  { %1058 = vmatprep.mubr.msk.bf16.mxu0 %vm259_vm0, %v1123_v22  ;;  %1090 = vmatprep.mubr.msk.bf16.mxu1 %vm259_vm0, %v1139_v27 }
  0x36   :  { %1059 = vmatmul.mubr.msk.bf16.gmra.mrb[20].mxu0 %vm259_vm0, %v1124_v24  ;;  %1091 = vmatmul.mubr.msk.bf16.gmra.mrb[20].mxu1 %vm259_vm0, %v1140_v29 }
  0x37   :  { %1062 = vmatprep.mubr.msk.bf16.mxu0 %vm259_vm0, %v1125_v26  ;;  %1094 = vmatprep.mubr.msk.bf16.mxu1 %vm259_vm0, %v1141_v31 }
  0x3e   :  { %1063 = vmatmul.mubr.msk.bf16.gmra.mrb[24].mxu0 %vm259_vm0, %v1126_v28  ;;  %1095 = vmatmul.mubr.msk.bf16.gmra.mrb[24].mxu1 %vm259_vm0, %v1142_v33 }
  0x3f   :  { %1066 = vmatprep.mubr.msk.bf16.mxu0 %vm259_vm0, %v1127_v30  ;;  %1098 = vmatprep.mubr.msk.bf16.mxu1 %vm259_vm0, %v1143_v34 }
  0x46   :  { %1067 = vmatmul.mubr.msk.bf16.gmra.mrb[28].mxu0 %vm259_vm0, %v1128_v32  ;;  %1099 = vmatmul.mubr.msk.bf16.gmra.mrb[28].mxu1 %vm259_vm0, %v1144_v35 }
  0xe1   :  { %v1040_v36 = vpop.f32.mrb[0].mxu0  ;;  %v1323_v50 = vpop.f32.mrb[0].mxu1 }
  0xe2   :  { %856 = vst.msk [vmem:[%s1763_s4 + $0x10] sm:$0xff] %vm853_vm2, %v1040_v36  ;;  %v394_v37 = vpop.f32.mrb[1].mxu0  ;;  %v721_v43 = vmul.f32 %v1040_v36, %v1040_v36  ;;  %888 = vst.msk [vmem:[%s1763_s4 + $0x110] sm:$0xff] %vm853_vm2, %v1323_v50  ;;  %v1334_v52 = vpop.f32.mrb[1].mxu1 }
  0xe3   :  { %854 = vst.msk [vmem:[%s1763_s4] sm:$0xff] %vm853_vm2, %v394_v37  ;;  %v1041_v38 = vpop.f32.mrb[2].mxu0  ;;  %v719_v40 = vmul.f32 %v394_v37, %v394_v37  ;;  %886 = vst.msk [vmem:[%s1763_s4 + $0x100] sm:$0xff] %vm853_vm2, %v1334_v52  ;;  %v1345_v57 = vpop.f32.mrb[2].mxu1 }
  0xe4   :  { %857 = vst.msk [vmem:[%s1763_s4 + $0x18] sm:$0xff] %vm853_vm2, %v1041_v38  ;;  %v397_v39 = vpop.f32.mrb[3].mxu0  ;;  %v722_v46 = vmul.f32 %v1041_v38, %v1041_v38  ;;  %889 = vst.msk [vmem:[%s1763_s4 + $0x118] sm:$0xff] %vm853_vm2, %v1345_v57  ;;  %v1356_v59 = vpop.f32.mrb[3].mxu1 }
  0xe5   :  { %v649_v41 = vadd.f32 %v397_v39, %v394_v37  ;;  %v720_v42 = vmul.f32 %v397_v39, %v397_v39  ;;  %855 = vst.msk [vmem:[%s1763_s4 + $0x8] sm:$0xff] %vm853_vm2, %v397_v39  ;;  %887 = vst.msk [vmem:[%s1763_s4 + $0x108] sm:$0xff] %vm853_vm2, %v1356_v59 }
  0xe7   :  { %v650_v44 = vadd.f32 %v1040_v36, %v649_v41  ;;  %v783_v45 = vadd.f32 %v720_v42, %v719_v40 }
  0xe9   :  { %v784_v47 = vadd.f32 %v783_v45, %v721_v43  ;;  %v1044_v48 = vpop.f32.mrb[4].mxu0  ;;  %v651_v49 = vadd.f32 %v1041_v38, %v650_v44  ;;  %v1367_v6 = vpop.f32.mrb[4].mxu1 }
  0xea   :  { %860 = vst.msk [vmem:[%s1763_s4 + $0x30] sm:$0xff] %vm853_vm2, %v1044_v48  ;;  %v410_v51 = vpop.f32.mrb[5].mxu0  ;;  %v725_v63 = vmul.f32 %v1044_v48, %v1044_v48  ;;  %892 = vst.msk [vmem:[%s1763_s4 + $0x130] sm:$0xff] %vm853_vm2, %v1367_v6  ;;  %v1378_v8 = vpop.f32.mrb[5].mxu1 }
  0xeb   :  { %v652_v53 = vadd.f32 %v651_v49, %v410_v51  ;;  %v723_v54 = vmul.f32 %v410_v51, %v410_v51  ;;  %v785_v55 = vadd.f32 %v784_v47, %v722_v46  ;;  %858 = vst.msk [vmem:[%s1763_s4 + $0x20] sm:$0xff] %vm853_vm2, %v410_v51  ;;  %v1045_v56 = vpop.f32.mrb[6].mxu0  ;;  %890 = vst.msk [vmem:[%s1763_s4 + $0x120] sm:$0xff] %vm853_vm2, %v1378_v8  ;;  %v1389_v13 = vpop.f32.mrb[6].mxu1 }
  0xec   :  { %861 = vst.msk [vmem:[%s1763_s4 + $0x38] sm:$0xff] %vm853_vm2, %v1045_v56  ;;  %v413_v58 = vpop.f32.mrb[7].mxu0  ;;  %v726_v2 = vmul.f32 %v1045_v56, %v1045_v56  ;;  %893 = vst.msk [vmem:[%s1763_s4 + $0x138] sm:$0xff] %vm853_vm2, %v1389_v13  ;;  %v1400_v15 = vpop.f32.mrb[7].mxu1 }
  0xed   :  { %v786_v60 = vadd.f32 %v785_v55, %v723_v54  ;;  %v653_v61 = vadd.f32 %v652_v53, %v413_v58  ;;  %v724_v62 = vmul.f32 %v413_v58, %v413_v58  ;;  %859 = vst.msk [vmem:[%s1763_s4 + $0x28] sm:$0xff] %vm853_vm2, %v413_v58  ;;  %891 = vst.msk [vmem:[%s1763_s4 + $0x128] sm:$0xff] %vm853_vm2, %v1400_v15 }
  0xef   :  { %v654_v0 = vadd.f32 %v1044_v48, %v653_v61  ;;  %v787_v1 = vadd.f32 %v786_v60, %v724_v62 }
  0xf1   :  { %v788_v3 = vadd.f32 %v787_v1, %v725_v63  ;;  %v1048_v4 = vpop.f32.mrb[8].mxu0  ;;  %v655_v5 = vadd.f32 %v1045_v56, %v654_v0  ;;  %v1411_v26 = vpop.f32.mrb[8].mxu1 }
  0xf2   :  { %864 = vst.msk [vmem:[%s1763_s4 + $0x50] sm:$0xff] %vm853_vm2, %v1048_v4  ;;  %v426_v7 = vpop.f32.mrb[9].mxu0  ;;  %v729_v19 = vmul.f32 %v1048_v4, %v1048_v4  ;;  %896 = vst.msk [vmem:[%s1763_s4 + $0x150] sm:$0xff] %vm853_vm2, %v1411_v26  ;;  %v1422_v28 = vpop.f32.mrb[9].mxu1 }
  0xf3   :  { %v656_v9 = vadd.f32 %v655_v5, %v426_v7  ;;  %v727_v10 = vmul.f32 %v426_v7, %v426_v7  ;;  %v789_v11 = vadd.f32 %v788_v3, %v726_v2  ;;  %862 = vst.msk [vmem:[%s1763_s4 + $0x40] sm:$0xff] %vm853_vm2, %v426_v7  ;;  %v1049_v12 = vpop.f32.mrb[10].mxu0  ;;  %894 = vst.msk [vmem:[%s1763_s4 + $0x140] sm:$0xff] %vm853_vm2, %v1422_v28  ;;  %v1433_v33 = vpop.f32.mrb[10].mxu1 }
  0xf4   :  { %865 = vst.msk [vmem:[%s1763_s4 + $0x58] sm:$0xff] %vm853_vm2, %v1049_v12  ;;  %v429_v14 = vpop.f32.mrb[11].mxu0  ;;  %v730_v22 = vmul.f32 %v1049_v12, %v1049_v12  ;;  %897 = vst.msk [vmem:[%s1763_s4 + $0x158] sm:$0xff] %vm853_vm2, %v1433_v33  ;;  %v1444_v35 = vpop.f32.mrb[11].mxu1 }
  0xf5   :  { %v790_v16 = vadd.f32 %v789_v11, %v727_v10  ;;  %v657_v17 = vadd.f32 %v656_v9, %v429_v14  ;;  %v728_v18 = vmul.f32 %v429_v14, %v429_v14  ;;  %863 = vst.msk [vmem:[%s1763_s4 + $0x48] sm:$0xff] %vm853_vm2, %v429_v14  ;;  %895 = vst.msk [vmem:[%s1763_s4 + $0x148] sm:$0xff] %vm853_vm2, %v1444_v35 }
  0xf7   :  { %v658_v20 = vadd.f32 %v1048_v4, %v657_v17  ;;  %v791_v21 = vadd.f32 %v790_v16, %v728_v18 }
  0xf9   :  { %v792_v23 = vadd.f32 %v791_v21, %v729_v19  ;;  %v1052_v24 = vpop.f32.mrb[12].mxu0  ;;  %v659_v25 = vadd.f32 %v1049_v12, %v658_v20  ;;  %v1455_v46 = vpop.f32.mrb[12].mxu1 }
  0xfa   :  { %868 = vst.msk [vmem:[%s1763_s4 + $0x70] sm:$0xff] %vm853_vm2, %v1052_v24  ;;  %v442_v27 = vpop.f32.mrb[13].mxu0  ;;  %v733_v39 = vmul.f32 %v1052_v24, %v1052_v24  ;;  %900 = vst.msk [vmem:[%s1763_s4 + $0x170] sm:$0xff] %vm853_vm2, %v1455_v46  ;;  %v1466_v48 = vpop.f32.mrb[13].mxu1 }
  0xfb   :  { %v660_v29 = vadd.f32 %v659_v25, %v442_v27  ;;  %v731_v30 = vmul.f32 %v442_v27, %v442_v27  ;;  %v793_v31 = vadd.f32 %v792_v23, %v730_v22  ;;  %866 = vst.msk [vmem:[%s1763_s4 + $0x60] sm:$0xff] %vm853_vm2, %v442_v27  ;;  %v1053_v32 = vpop.f32.mrb[14].mxu0  ;;  %898 = vst.msk [vmem:[%s1763_s4 + $0x160] sm:$0xff] %vm853_vm2, %v1466_v48  ;;  %v1477_v55 = vpop.f32.mrb[14].mxu1 }
  0xfc   :  { %869 = vst.msk [vmem:[%s1763_s4 + $0x78] sm:$0xff] %vm853_vm2, %v1053_v32  ;;  %v445_v34 = vpop.f32.mrb[15].mxu0  ;;  %v734_v42 = vmul.f32 %v1053_v32, %v1053_v32  ;;  %901 = vst.msk [vmem:[%s1763_s4 + $0x178] sm:$0xff] %vm853_vm2, %v1477_v55  ;;  %v1488_v58 = vpop.f32.mrb[15].mxu1 }
  0xfd   :  { %v794_v36 = vadd.f32 %v793_v31, %v731_v30  ;;  %v661_v37 = vadd.f32 %v660_v29, %v445_v34  ;;  %v732_v38 = vmul.f32 %v445_v34, %v445_v34  ;;  %867 = vst.msk [vmem:[%s1763_s4 + $0x68] sm:$0xff] %vm853_vm2, %v445_v34  ;;  %899 = vst.msk [vmem:[%s1763_s4 + $0x168] sm:$0xff] %vm853_vm2, %v1488_v58 }
  0xff   :  { %v662_v40 = vadd.f32 %v1052_v24, %v661_v37  ;;  %v795_v41 = vadd.f32 %v794_v36, %v732_v38 }
 0x101   :  { %v796_v43 = vadd.f32 %v795_v41, %v733_v39  ;;  %v1056_v44 = vpop.f32.mrb[16].mxu0  ;;  %v663_v45 = vadd.f32 %v1053_v32, %v662_v40  ;;  %v1499_v7 = vpop.f32.mrb[16].mxu1 }
 0x102   :  { %872 = vst.msk [vmem:[%s1763_s4 + $0x90] sm:$0xff] %vm853_vm2, %v1056_v44  ;;  %v458_v47 = vpop.f32.mrb[17].mxu0  ;;  %v737_v63 = vmul.f32 %v1056_v44, %v1056_v44  ;;  %904 = vst.msk [vmem:[%s1763_s4 + $0x190] sm:$0xff] %vm853_vm2, %v1499_v7  ;;  %v1510_v10 = vpop.f32.mrb[17].mxu1 }
 0x103   :  { %v664_v49 = vadd.f32 %v663_v45, %v458_v47  ;;  %v735_v51 = vmul.f32 %v458_v47, %v458_v47  ;;  %v797_v53 = vadd.f32 %v796_v43, %v734_v42  ;;  %870 = vst.msk [vmem:[%s1763_s4 + $0x80] sm:$0xff] %vm853_vm2, %v458_v47  ;;  %v1057_v54 = vpop.f32.mrb[18].mxu0  ;;  %902 = vst.msk [vmem:[%s1763_s4 + $0x180] sm:$0xff] %vm853_vm2, %v1510_v10  ;;  %v1521_v17 = vpop.f32.mrb[18].mxu1 }
 0x104   :  { %873 = vst.msk [vmem:[%s1763_s4 + $0x98] sm:$0xff] %vm853_vm2, %v1057_v54  ;;  %v461_v56 = vpop.f32.mrb[19].mxu0  ;;  %v738_v2 = vmul.f32 %v1057_v54, %v1057_v54  ;;  %905 = vst.msk [vmem:[%s1763_s4 + $0x198] sm:$0xff] %vm853_vm2, %v1521_v17  ;;  %v1532_v19 = vpop.f32.mrb[19].mxu1 }
 0x105   :  { %v798_v60 = vadd.f32 %v797_v53, %v735_v51  ;;  %v665_v61 = vadd.f32 %v664_v49, %v461_v56  ;;  %v736_v62 = vmul.f32 %v461_v56, %v461_v56  ;;  %871 = vst.msk [vmem:[%s1763_s4 + $0x88] sm:$0xff] %vm853_vm2, %v461_v56  ;;  %903 = vst.msk [vmem:[%s1763_s4 + $0x188] sm:$0xff] %vm853_vm2, %v1532_v19 }
 0x107   :  { %v666_v0 = vadd.f32 %v1056_v44, %v665_v61  ;;  %v799_v1 = vadd.f32 %v798_v60, %v736_v62 }
 0x109   :  { %v800_v3 = vadd.f32 %v799_v1, %v737_v63  ;;  %v1060_v4 = vpop.f32.mrb[20].mxu0  ;;  %v667_v5 = vadd.f32 %v1057_v54, %v666_v0  ;;  %v1543_v32 = vpop.f32.mrb[20].mxu1 }
 0x10a   :  { %876 = vst.msk [vmem:[%s1763_s4 + $0xb0] sm:$0xff] %vm853_vm2, %v1060_v4  ;;  %v474_v9 = vpop.f32.mrb[21].mxu0  ;;  %v741_v23 = vmul.f32 %v1060_v4, %v1060_v4  ;;  %908 = vst.msk [vmem:[%s1763_s4 + $0x1b0] sm:$0xff] %vm853_vm2, %v1543_v32  ;;  %v1554_v36 = vpop.f32.mrb[21].mxu1 }
 0x10b   :  { %v668_v11 = vadd.f32 %v667_v5, %v474_v9  ;;  %v739_v12 = vmul.f32 %v474_v9, %v474_v9  ;;  %v801_v14 = vadd.f32 %v800_v3, %v738_v2  ;;  %874 = vst.msk [vmem:[%s1763_s4 + $0xa0] sm:$0xff] %vm853_vm2, %v474_v9  ;;  %v1061_v16 = vpop.f32.mrb[22].mxu0  ;;  %906 = vst.msk [vmem:[%s1763_s4 + $0x1a0] sm:$0xff] %vm853_vm2, %v1554_v36  ;;  %v1565_v41 = vpop.f32.mrb[22].mxu1 }
 0x10c   :  { %877 = vst.msk [vmem:[%s1763_s4 + $0xb8] sm:$0xff] %vm853_vm2, %v1061_v16  ;;  %v477_v18 = vpop.f32.mrb[23].mxu0  ;;  %v742_v27 = vmul.f32 %v1061_v16, %v1061_v16  ;;  %909 = vst.msk [vmem:[%s1763_s4 + $0x1b8] sm:$0xff] %vm853_vm2, %v1565_v41  ;;  %v1576_v43 = vpop.f32.mrb[23].mxu1 }
 0x10d   :  { %v802_v20 = vadd.f32 %v801_v14, %v739_v12  ;;  %v669_v21 = vadd.f32 %v668_v11, %v477_v18  ;;  %v740_v22 = vmul.f32 %v477_v18, %v477_v18  ;;  %875 = vst.msk [vmem:[%s1763_s4 + $0xa8] sm:$0xff] %vm853_vm2, %v477_v18  ;;  %907 = vst.msk [vmem:[%s1763_s4 + $0x1a8] sm:$0xff] %vm853_vm2, %v1576_v43 }
 0x10f   :  { %v670_v24 = vadd.f32 %v1060_v4, %v669_v21  ;;  %v803_v25 = vadd.f32 %v802_v20, %v740_v22 }
 0x111   :  { %v804_v29 = vadd.f32 %v803_v25, %v741_v23  ;;  %v1064_v30 = vpop.f32.mrb[24].mxu0  ;;  %v671_v31 = vadd.f32 %v1061_v16, %v670_v24  ;;  %v1587_v62 = vpop.f32.mrb[24].mxu1  ;;  %v751_v25 = vmul.f32 %v1334_v52, %v1334_v52 }
 0x112   :  { %880 = vst.msk [vmem:[%s1763_s4 + $0xd0] sm:$0xff] %vm853_vm2, %v1064_v30  ;;  %v490_v34 = vpop.f32.mrb[25].mxu0  ;;  %v745_v49 = vmul.f32 %v1064_v30, %v1064_v30  ;;  %912 = vst.msk [vmem:[%s1763_s4 + $0x1d0] sm:$0xff] %vm853_vm2, %v1587_v62  ;;  %v1598_v0 = vpop.f32.mrb[25].mxu1 }
 0x113   :  { %v672_v37 = vadd.f32 %v671_v31, %v490_v34  ;;  %v743_v38 = vmul.f32 %v490_v34, %v490_v34  ;;  %v805_v39 = vadd.f32 %v804_v29, %v742_v27  ;;  %878 = vst.msk [vmem:[%s1763_s4 + $0xc0] sm:$0xff] %vm853_vm2, %v490_v34  ;;  %v1065_v40 = vpop.f32.mrb[26].mxu0  ;;  %910 = vst.msk [vmem:[%s1763_s4 + $0x1c0] sm:$0xff] %vm853_vm2, %v1598_v0  ;;  %v1609_v5 = vpop.f32.mrb[26].mxu1 }
 0x114   :  { %881 = vst.msk [vmem:[%s1763_s4 + $0xd8] sm:$0xff] %vm853_vm2, %v1065_v40  ;;  %v493_v42 = vpop.f32.mrb[27].mxu0  ;;  %v746_v54 = vmul.f32 %v1065_v40, %v1065_v40  ;;  %913 = vst.msk [vmem:[%s1763_s4 + $0x1d8] sm:$0xff] %vm853_vm2, %v1609_v5  ;;  %v1620_v11 = vpop.f32.mrb[27].mxu1 }
 0x115   :  { %v806_v44 = vadd.f32 %v805_v39, %v743_v38  ;;  %v673_v45 = vadd.f32 %v672_v37, %v493_v42  ;;  %v744_v47 = vmul.f32 %v493_v42, %v493_v42  ;;  %879 = vst.msk [vmem:[%s1763_s4 + $0xc8] sm:$0xff] %vm853_vm2, %v493_v42  ;;  %911 = vst.msk [vmem:[%s1763_s4 + $0x1c8] sm:$0xff] %vm853_vm2, %v1620_v11 }
 0x116   :  { %v752_v39 = vmul.f32 %v1356_v59, %v1356_v59 }
 0x117   :  { %v674_v51 = vadd.f32 %v1064_v30, %v673_v45  ;;  %v807_v53 = vadd.f32 %v806_v44, %v744_v47  ;;  %v754_v45 = vmul.f32 %v1345_v57, %v1345_v57 }
 0x119   :  { %v808_v56 = vadd.f32 %v807_v53, %v745_v49  ;;  %v1068_v60 = vpop.f32.mrb[28].mxu0  ;;  %v675_v61 = vadd.f32 %v1065_v40, %v674_v51  ;;  %v1633_v27 = vpop.f32.mrb[28].mxu1  ;;  %v753_v40 = vmul.f32 %v1323_v50, %v1323_v50 }
 0x11a   :  { %884 = vst.msk [vmem:[%s1763_s4 + $0xf0] sm:$0xff] %vm853_vm2, %v1068_v60  ;;  %v506_v63 = vpop.f32.mrb[29].mxu0  ;;  %v749_v18 = vmul.f32 %v1068_v60, %v1068_v60  ;;  %916 = vst.msk [vmem:[%s1763_s4 + $0x1f0] sm:$0xff] %vm853_vm2, %v1633_v27  ;;  %v1640_v29 = vpop.f32.mrb[29].mxu1 }
 0x11b   :  { %v676_v1 = vadd.f32 %v675_v61, %v506_v63  ;;  %v747_v2 = vmul.f32 %v506_v63, %v506_v63  ;;  %v809_v3 = vadd.f32 %v808_v56, %v746_v54  ;;  %882 = vst.msk [vmem:[%s1763_s4 + $0xe0] sm:$0xff] %vm853_vm2, %v506_v63  ;;  %v1069_v4 = vpop.f32.mrb[30].mxu0  ;;  %914 = vst.msk [vmem:[%s1763_s4 + $0x1e0] sm:$0xff] %vm853_vm2, %v1640_v29  ;;  %v1648_v34 = vpop.f32.mrb[30].mxu1 }
 0x11c   :  { %885 = vst.msk [vmem:[%s1763_s4 + $0xf8] sm:$0xff] %vm853_vm2, %v1069_v4  ;;  %v509_v9 = vpop.f32.mrb[31].mxu0  ;;  %v750_v22 = vmul.f32 %v1069_v4, %v1069_v4  ;;  %917 = vst.msk [vmem:[%s1763_s4 + $0x1f8] sm:$0xff] %vm853_vm2, %v1648_v34  ;;  %v1655_v37 = vpop.f32.mrb[31].mxu1 }
 0x11d   :  { %v810_v12 = vadd.f32 %v809_v3, %v747_v2  ;;  %v677_v14 = vadd.f32 %v676_v1, %v509_v9  ;;  %v748_v16 = vmul.f32 %v509_v9, %v509_v9  ;;  %883 = vst.msk [vmem:[%s1763_s4 + $0xe8] sm:$0xff] %vm853_vm2, %v509_v9  ;;  %915 = vst.msk [vmem:[%s1763_s4 + $0x1e8] sm:$0xff] %vm853_vm2, %v1655_v37 }
 0x11f   :  { %v678_v20 = vadd.f32 %v1068_v60, %v677_v14  ;;  %v811_v21 = vadd.f32 %v810_v12, %v748_v16  ;;  %v756_v60 = vmul.f32 %v1400_v15, %v1400_v15  ;;  %v760_v12 = vmul.f32 %v1444_v35, %v1444_v35 }
 0x121   :  { %v812_v23 = vadd.f32 %v811_v21, %v749_v18  ;;  %v679_v24 = vadd.f32 %v1069_v4, %v678_v20 }
 0x123   :  { %v680_v30 = vadd.f32 %v679_v24, %v1334_v52  ;;  %v813_v31 = vadd.f32 %v812_v23, %v750_v22  ;;  %v764_v24 = vmul.f32 %v1488_v58, %v1488_v58 }
 0x125   :  { %v814_v38 = vadd.f32 %v813_v31, %v751_v25  ;;  %v681_v52 = vadd.f32 %v680_v30, %v1356_v59  ;;  %v755_v59 = vmul.f32 %v1378_v8, %v1378_v8 }
 0x127   :  { %v682_v42 = vadd.f32 %v1323_v50, %v681_v52  ;;  %v815_v44 = vadd.f32 %v814_v38, %v752_v39  ;;  %v757_v50 = vmul.f32 %v1367_v6, %v1367_v6 }
 0x129   :  { %v816_v47 = vadd.f32 %v815_v44, %v753_v40  ;;  %v683_v49 = vadd.f32 %v1345_v57, %v682_v42  ;;  %v758_v57 = vmul.f32 %v1389_v13, %v1389_v13  ;;  %v768_v42 = vmul.f32 %v1532_v19, %v1532_v19 }
 0x12b   :  { %v684_v51 = vadd.f32 %v683_v49, %v1378_v8  ;;  %v817_v53 = vadd.f32 %v816_v47, %v754_v45  ;;  %v759_v8 = vmul.f32 %v1422_v28, %v1422_v28 }
 0x12d   :  { %v818_v54 = vadd.f32 %v817_v53, %v755_v59  ;;  %v685_v56 = vadd.f32 %v684_v51, %v1400_v15 }
 0x12f   :  { %v686_v61 = vadd.f32 %v1367_v6, %v685_v56  ;;  %v819_v63 = vadd.f32 %v818_v54, %v756_v60  ;;  %v761_v6 = vmul.f32 %v1411_v26, %v1411_v26  ;;  %v772_v54 = vmul.f32 %v1576_v43, %v1576_v43 }
 0x131   :  { %v820_v1 = vadd.f32 %v819_v63, %v757_v50  ;;  %v687_v2 = vadd.f32 %v1389_v13, %v686_v61  ;;  %v762_v13 = vmul.f32 %v1433_v33, %v1433_v33 }
 0x133   :  { %v688_v3 = vadd.f32 %v687_v2, %v1422_v28  ;;  %v821_v4 = vadd.f32 %v820_v1, %v758_v57  ;;  %v763_v28 = vmul.f32 %v1466_v48, %v1466_v48  ;;  %v776_v2 = vmul.f32 %v1620_v11, %v1620_v11 }
 0x135   :  { %v822_v9 = vadd.f32 %v821_v4, %v759_v8  ;;  %v689_v15 = vadd.f32 %v688_v3, %v1444_v35 }
 0x137   :  { %v690_v14 = vadd.f32 %v1411_v26, %v689_v15  ;;  %v823_v16 = vadd.f32 %v822_v9, %v760_v12  ;;  %v765_v26 = vmul.f32 %v1455_v46, %v1455_v46 }
 0x139   :  { %v824_v18 = vadd.f32 %v823_v16, %v761_v6  ;;  %v691_v20 = vadd.f32 %v1433_v33, %v690_v14  ;;  %v766_v33 = vmul.f32 %v1477_v55, %v1477_v55  ;;  %v780_v14 = vmul.f32 %v1655_v37, %v1655_v37 }
 0x13b   :  { %v692_v21 = vadd.f32 %v691_v20, %v1466_v48  ;;  %v825_v22 = vadd.f32 %v824_v18, %v762_v13  ;;  %v767_v48 = vmul.f32 %v1510_v10, %v1510_v10 }
 0x13d   :  { %v826_v23 = vadd.f32 %v825_v22, %v763_v28  ;;  %v693_v35 = vadd.f32 %v692_v21, %v1488_v58 }
 0x13f   :  { %v694_v25 = vadd.f32 %v1455_v46, %v693_v35  ;;  %v827_v30 = vadd.f32 %v826_v23, %v764_v24  ;;  %v769_v46 = vmul.f32 %v1499_v7, %v1499_v7 }
 0x141   :  { %v828_v31 = vadd.f32 %v827_v30, %v765_v26  ;;  %v695_v38 = vadd.f32 %v1477_v55, %v694_v25  ;;  %v770_v55 = vmul.f32 %v1521_v17, %v1521_v17 }
 0x143   :  { %v696_v52 = vadd.f32 %v695_v38, %v1510_v10  ;;  %v829_v39 = vadd.f32 %v828_v31, %v766_v33  ;;  %v771_v10 = vmul.f32 %v1554_v36, %v1554_v36 }
 0x145   :  { %v830_v40 = vadd.f32 %v829_v39, %v767_v48  ;;  %v697_v58 = vadd.f32 %v696_v52, %v1532_v19 }
 0x147   :  { %v698_v44 = vadd.f32 %v1499_v7, %v697_v58  ;;  %v831_v45 = vadd.f32 %v830_v40, %v768_v42  ;;  %v773_v7 = vmul.f32 %v1543_v32, %v1543_v32 }
 0x149   :  { %v832_v47 = vadd.f32 %v831_v45, %v769_v46  ;;  %v699_v49 = vadd.f32 %v1521_v17, %v698_v44  ;;  %v774_v17 = vmul.f32 %v1565_v41, %v1565_v41 }
 0x14b   :  { %v700_v59 = vadd.f32 %v699_v49, %v1554_v36  ;;  %v833_v51 = vadd.f32 %v832_v47, %v770_v55  ;;  %v775_v36 = vmul.f32 %v1598_v0, %v1598_v0 }
 0x14d   :  { %v834_v53 = vadd.f32 %v833_v51, %v771_v10  ;;  %v701_v19 = vadd.f32 %v700_v59, %v1576_v43 }
 0x14f   :  { %v702_v56 = vadd.f32 %v1543_v32, %v701_v19  ;;  %v835_v60 = vadd.f32 %v834_v53, %v772_v54  ;;  %v777_v32 = vmul.f32 %v1587_v62, %v1587_v62 }
 0x151   :  { %v836_v50 = vadd.f32 %v835_v60, %v773_v7  ;;  %v703_v61 = vadd.f32 %v1565_v41, %v702_v56  ;;  %v778_v41 = vmul.f32 %v1609_v5, %v1609_v5 }
 0x153   :  { %v704_v63 = vadd.f32 %v703_v61, %v1598_v0  ;;  %v837_v57 = vadd.f32 %v836_v50, %v774_v17  ;;  %v779_v0 = vmul.f32 %v1640_v29, %v1640_v29 }
 0x155   :  { %v838_v1 = vadd.f32 %v837_v57, %v775_v36  ;;  %v705_v43 = vadd.f32 %v704_v63, %v1620_v11 }
 0x157   :  { %v706_v8 = vadd.f32 %v1587_v62, %v705_v43  ;;  %v839_v3 = vadd.f32 %v838_v1, %v776_v2  ;;  %v781_v62 = vmul.f32 %v1633_v27, %v1633_v27 }
 0x159   :  { %v840_v4 = vadd.f32 %v839_v3, %v777_v32  ;;  %v707_v9 = vadd.f32 %v1609_v5, %v706_v8  ;;  %v782_v5 = vmul.f32 %v1648_v34, %v1648_v34 }
 0x15b   :  { %v708_v15 = vadd.f32 %v707_v9, %v1640_v29  ;;  %v841_v12 = vadd.f32 %v840_v4, %v778_v41 }
 0x15d   :  { %v842_v6 = vadd.f32 %v841_v12, %v779_v0  ;;  %v709_v11 = vadd.f32 %v708_v15, %v1655_v37 }
 0x15f   :  { %v710_v16 = vadd.f32 %v1633_v27, %v709_v11  ;;  %v843_v13 = vadd.f32 %v842_v6, %v780_v14 }
 0x161   :  { %v711_v18 = vadd.f32 %v1648_v34, %v710_v16  ;;  %v844_v20 = vadd.f32 %v843_v13, %v781_v62 }
 0x163   :  { %v712_v29 = vrot.slane %v711_v18, 4  ;;  %v845_v28 = vadd.f32 %v844_v20, %v782_v5 }
 0x165   :  { %v713_v21 = vadd.f32 %v712_v29, %v711_v18  ;;  %v846_v22 = vrot.slane %v845_v28, 4 }
 0x167   :  { %v714_v23 = vrot.slane %v713_v21, 2  ;;  %v847_v35 = vadd.f32 %v846_v22, %v845_v28 }
 0x169   :  { %v715_v24 = vadd.f32 %v714_v23, %v713_v21  ;;  %v848_v37 = vrot.slane %v847_v35, 2 }
 0x16b   :  { %v716_v26 = vrot.slane %v715_v24, 1  ;;  %v849_v25 = vadd.f32 %v848_v37, %v847_v35 }
 0x16d   :  { %v717_v30 = vadd.f32 %v716_v26, %v715_v24  ;;  %v850_v33 = vrot.slane %v849_v25, 1 }
 0x16f   :  { %718 = vst [vmem:[%s1764_s2] sm:$0x1] %v717_v30  ;;  %v851_v27 = vadd.f32 %v850_v33, %v849_v25 }
 0x171   :  { %852 = vst [vmem:[%s1765_s3] sm:$0x1] %v851_v27 }

</bundles_post_ra>
